<compile_context>
chip_gen: v5e
topology: v5e:2x2
jax: 0.10.0
libtpu: 0.0.40
codegen_flags: <defaults>
</compile_context>

<pallas_src>
import math

import jax
import jax.numpy as jnp
from jax.experimental import pallas as pl
from jax.experimental.pallas import tpu as pltpu


def _resolve_shape(total, shape):
    """Resolve a single -1 entry like torch.Tensor.view does."""
    shape = list(shape)
    if shape.count(-1) > 1:
        raise ValueError("only one -1 allowed in view shape")
    if -1 in shape:
        known = 1
        for s in shape:
            if s != -1:
                known *= s
        if known == 0 or total % known != 0:
            raise ValueError(f"cannot view {total} elements as {tuple(shape)}")
        shape[shape.index(-1)] = total // known
    if math.prod(shape) != total:
        raise ValueError(f"shape {tuple(shape)} is invalid for input of size {total}")
    return tuple(shape)


def _partition_leading(lead, max_chunks=4, quantum=1):
    """Split [0, lead) into <= max_chunks contiguous (start, size) pieces.

    Chunk starts are quantum-aligned; only the final piece may be ragged."""
    if lead <= 0:
        return []
    if max_chunks <= 1 or lead <= quantum:
        return [(0, lead)]
    n_quanta = -(-lead // quantum)                     # cdiv
    n_chunks = min(max_chunks, n_quanta)
    per = (-(-n_quanta // n_chunks)) * quantum         # elements per chunk
    parts = []
    start = 0
    while start < lead:
        size = min(per, lead - start)
        parts.append((start, size))
        start += size
    return parts


def _make_dma_copy_kernel(chunks, sliced):
    """Kernel that copies x -> o entirely with HBM->HBM DMAs (no VMEM)."""

    def kernel(x_ref, o_ref, sem_ref):
        copies = []
        if not sliced:
            # Whole-array copy in one DMA.
            copies.append(pltpu.make_async_copy(x_ref, o_ref, sem_ref.at[0]))
        else:
            # A few concurrent DMAs over disjoint leading-dim chunks
            # (static Python starts/sizes -> zero runtime index cost).
            for idx, (start, size) in enumerate(chunks):
                copies.append(
                    pltpu.make_async_copy(
                        x_ref.at[pl.ds(start, size)],
                        o_ref.at[pl.ds(start, size)],
                        sem_ref.at[idx],
                    )
                )
        for cp in copies:   # issue all transfers
            cp.start()
        for cp in copies:   # then wait for all of them
            cp.wait()

    return kernel


def pallas_view(x, shape):
    """Equivalent of `x.view(*shape)`; the data movement is a direct
    HBM->HBM DMA issued from a Pallas kernel (no VMEM staging, no padding)."""
    total = math.prod(x.shape)
    out_shape = _resolve_shape(total, shape)

    # Zero-element tensors: nothing to copy, metadata-only reshape.
    if total == 0:
        return x.reshape(out_shape)

    # Present the data in the requested view shape.  Row-major flattening is
    # exactly torch .view element order on a contiguous tensor; this is
    # metadata/layout glue -- the data movement itself happens in the kernel.
    x_r = x.reshape(out_shape)

    itemsize = jnp.dtype(x.dtype).itemsize

    if len(out_shape) == 0:
        chunks = [(0, 1)]
        sliced = False
    else:
        lead = out_shape[0]
        # Rank-1 outputs: keep chunk starts 1024-element aligned; for rank>=2
        # chunk boundaries fall on whole (contiguous) leading-dim rows.
        quantum = 1024 if len(out_shape) == 1 else 1
        if total * itemsize < (1 << 20):
            # Tiny copy: one DMA, no point splitting.
            chunks = [(0, lead)]
        else:
            chunks = _partition_leading(lead, max_chunks=4, quantum=quantum)
        sliced = len(chunks) > 1

    kernel = _make_dma_copy_kernel(chunks, sliced)

    out = pl.pallas_call(
        kernel,
        out_shape=jax.ShapeDtypeStruct(out_shape, x.dtype),
        # Both operands stay in HBM; the kernel DMAs between them directly.
        in_specs=[pl.BlockSpec(memory_space=pl.ANY)],
        out_specs=pl.BlockSpec(memory_space=pl.ANY),
        scratch_shapes=[pltpu.SemaphoreType.DMA((max(len(chunks), 1),))],
        compiler_params=pltpu.CompilerParams(has_side_effects=True),
        cost_estimate=pl.CostEstimate(
            flops=0,
            transcendentals=0,
            bytes_accessed=2 * total * itemsize,
        ),
    )(x_r)
    return out


class View:
    """JAX/Pallas mirror of the PyTorch View module."""

    def __init__(self, shape):
        self.shape = shape

    def __call__(self, x):
        return pallas_view(x, self.shape)


if __name__ == "__main__":
    key = jax.random.PRNGKey(0)

    # 1) Typical use: flatten conv features before an FC layer.
    x = jax.random.normal(key, (2, 4, 16, 16), dtype=jnp.float32)
    out = jax.block_until_ready(View((-1, 4 * 16 * 16))(x))
    ref = x.reshape(2, 4 * 16 * 16)
    assert out.shape == (2, 1024) and out.dtype == x.dtype
    assert jnp.array_equal(out, ref), "Pallas view output mismatch"

    # 2) Ragged size (105 elements), rank-1 output -- no padding anywhere now.
    y = jax.random.normal(jax.random.PRNGKey(1), (3, 5, 7), dtype=jnp.float32)
    out2 = jax.block_until_ready(View((-1,))(y))
    assert jnp.array_equal(out2, y.reshape(-1)), "ragged-path mismatch"

    # 3) Sub-32-bit dtype: DMA is dtype-agnostic, no bitcast needed.
    z = jax.random.normal(jax.random.PRNGKey(2), (2, 3, 40), dtype=jnp.bfloat16)
    out3 = jax.block_until_ready(View((6, -1))(z))
    assert out3.dtype == jnp.bfloat16
    assert jnp.array_equal(out3, z.reshape(6, 40)), "bf16-path mismatch"

    # 4) >=1 MiB input exercises the chunked multi-DMA path (4 concurrent DMAs).
    w = jax.random.normal(jax.random.PRNGKey(3), (256, 32, 32), dtype=jnp.float32)
    out4 = jax.block_until_ready(View((-1, 32 * 32))(w))
    assert jnp.array_equal(out4, w.reshape(256, 1024)), "chunked-path mismatch"

    # 5) Zero-element tensor: metadata-only early return.
    e = jnp.zeros((0, 4), dtype=jnp.float32)
    out5 = jax.block_until_ready(View((-1, 4))(e))
    assert out5.shape == (0, 4)

    print("KERNEL_OK")
</pallas_src>

<mosaic_0001>
module attributes {stable_mosaic.version = 11 : i64} {
  func.func @kernel(%arg0: memref<2x1024xf32, #tpu.memory_space<any>>, %arg1: memref<2x1024xf32, #tpu.memory_space<any>>, %arg2: memref<1x!tpu.dma_semaphore, #tpu.memory_space<semaphore_mem>>) attributes {dimension_semantics = [], scalar_prefetch = 0 : i64, scratch_operands = 1 : i64, tpu.core_type = #tpu.core_type<tc>} {
    %c0_i32 = arith.constant 0 : i32
    %0 = tpu.memref_slice %arg2[%c0_i32] : memref<1x!tpu.dma_semaphore, #tpu.memory_space<semaphore_mem>> -> memref<1x!tpu.dma_semaphore, #tpu.memory_space<semaphore_mem>>
    %1 = tpu.memref_squeeze %0 : memref<1x!tpu.dma_semaphore, #tpu.memory_space<semaphore_mem>> -> memref<!tpu.dma_semaphore, #tpu.memory_space<semaphore_mem>>
    tpu.enqueue_dma source(%arg0 : memref<2x1024xf32, #tpu.memory_space<any>>) target(%arg1 : memref<2x1024xf32, #tpu.memory_space<any>>) target_semaphore(%1 : memref<!tpu.dma_semaphore, #tpu.memory_space<semaphore_mem>>)
    %c0_i32_0 = arith.constant 0 : i32
    %2 = tpu.memref_slice %arg2[%c0_i32_0] : memref<1x!tpu.dma_semaphore, #tpu.memory_space<semaphore_mem>> -> memref<1x!tpu.dma_semaphore, #tpu.memory_space<semaphore_mem>>
    %3 = tpu.memref_squeeze %2 : memref<1x!tpu.dma_semaphore, #tpu.memory_space<semaphore_mem>> -> memref<!tpu.dma_semaphore, #tpu.memory_space<semaphore_mem>>
    tpu.wait_dma2 semaphore(%3 : memref<!tpu.dma_semaphore, #tpu.memory_space<semaphore_mem>>) src(%arg0 : memref<2x1024xf32, #tpu.memory_space<any>>) dst(%arg1 : memref<2x1024xf32, #tpu.memory_space<any>>)
    return
  }
}

</mosaic_0001>

<bundles_post_ra>
// kernel: tpu_custom_call.1
= control target key start
LH: loop header
LB: loop body
LE: loop exit
PB: predicated region body
PF: predicated region fallthrough
CT: control target
= control target key end

     0   :  { %s33_s12 = smov [#allocation2]   ;;  %s34_s13 = smov [#allocation3]   ;;  %s52_s0 = inlined_call_operand.hbm [shape: f32[2,1024], index: 0, kind: input, shape index: {}]   ;;  %s53_s1 = inlined_call_operand.hbm [shape: f32[2,1024], index: 1, kind: output, shape index: {}]  }
   0x1   :  { %s10_s8 = sshll.u32 %s52_s0, 4  ;;  %s12_s11 = sshll.u32 %s53_s1, 4  ;;  %s11_s8 = int_to_ptr.hbm [resolvable:$true] %s10_s8  ;;  %s13_s11 = int_to_ptr.hbm [resolvable:$true] %s12_s11 }
   0x2   :  { %s35_s14 = smov 0  }
   0x3   :  { %16 = dma.general %s11_s8, 256, %s13_s11, %s33_s12, %s34_s13, [#allocation4], %s35_s14, 0  }
   0x4   :  { %31 = dma.done.wait [#allocation2], 256 }
   0x5   :  { %32 = vsyncadd [#allocation2], 4294967040 }
   0x6   :  { %21 = vsyncmov [#allocation2] }
   0x9   :  { %s22_s15 = vpop.sfrf %21 }
   0xa   :  { %p27_p0 = scmp.ne.s32.totalorder %s22_s15, 0 }
   0xc   :  { %26 = shalt.err (%p27_p0)  }

</bundles_post_ra>
